<compile_context>
chip_gen: v7x
topology: tpu7x:2x2x1
jax: 0.10.0
libtpu: 0.0.40
codegen_flags: <defaults>
</compile_context>

<pallas_src>
import jax
import jax.numpy as jnp
from jax.experimental import pallas as pl
from jax.experimental.pallas import tpu as pltpu

LAYERS = [2, 20, 20, 20, 3]
F_HID_PAD = 24      # 20 -> 24 hidden rows (multiple of 8 sublanes for f32)
CHUNK = 512         # inner lane-chunk width (live (24, CHUNK) f32 activation = 12 vregs)
MAX_TB = 4096       # batch tile (lanes) per grid step; multiple of CHUNK


def _round_up(x, m):
    return ((x + m - 1) // m) * m


def _pinn_kernel(x_ref,
                 w0_ref, b0_ref,
                 w1_ref, b1_ref,
                 w2_ref, b2_ref,
                 w3_ref, b3_ref,
                 o_ref):
    # x_ref: (2, TB) f32; wX_ref: bf16 (out_pad, in_pad); bX_ref: f32 (out_pad, CHUNK)
    # pre-broadcast along lanes; o_ref: (3, TB) f32.
    num_chunks = x_ref.shape[-1] // CHUNK

    def chunk(c, carry):
        j = pl.multiple_of(c * CHUNK, CHUNK)
        h = x_ref[:, pl.ds(j, CHUNK)].astype(jnp.bfloat16)             # (2, CHUNK)
        # layer 0 + tanh -> (24, CHUNK)
        z = jnp.dot(w0_ref[...], h, preferred_element_type=jnp.float32) + b0_ref[...]
        h = jnp.tanh(z).astype(jnp.bfloat16)
        # layer 1 + tanh
        z = jnp.dot(w1_ref[...], h, preferred_element_type=jnp.float32) + b1_ref[...]
        h = jnp.tanh(z).astype(jnp.bfloat16)
        # layer 2 + tanh
        z = jnp.dot(w2_ref[...], h, preferred_element_type=jnp.float32) + b2_ref[...]
        h = jnp.tanh(z).astype(jnp.bfloat16)
        # layer 3 (linear output) -> (3, CHUNK), lane-dense store
        o = jnp.dot(w3_ref[...], h, preferred_element_type=jnp.float32) + b3_ref[...]
        o_ref[:, pl.ds(j, CHUNK)] = o.astype(o_ref.dtype)
        return carry

    jax.lax.fori_loop(0, num_chunks, chunk, 0, unroll=True)


def prepare_params(params):
    """Pad torch-style params (W:(out,in), b:(out,)) for the kernel.

    Weights -> bf16, zero-padded rows/cols; biases -> f32, zero-padded rows and
    pre-broadcast along lanes to CHUNK columns (no in-kernel lane broadcast).
    Zero padding stays inert through tanh, so it never contaminates real outputs.
    """
    out_pads = [F_HID_PAD, F_HID_PAD, F_HID_PAD, LAYERS[-1]]
    in_pads = [LAYERS[0], F_HID_PAD, F_HID_PAD, F_HID_PAD]
    prepared = []
    for (w, b), op, ip in zip(params, out_pads, in_pads):
        w = jnp.asarray(w, jnp.float32)
        b = jnp.asarray(b, jnp.float32)
        w_p = jnp.pad(w, ((0, op - w.shape[0]), (0, ip - w.shape[1])))
        b_p = jnp.pad(b, (0, op - b.shape[0]))
        prepared.append(w_p.astype(jnp.bfloat16))
        prepared.append(jnp.broadcast_to(b_p[:, None], (op, CHUNK)))
    return tuple(prepared)


@jax.jit
def pinn_forward_fm(x_fm, prepared):
    """Feature-major forward: x_fm (2, N) float32 -> (3, N) float32 (no transposes)."""
    fin, n = x_fm.shape
    assert fin == LAYERS[0]

    tb = min(MAX_TB, _round_up(max(n, 1), CHUNK))   # multiple of CHUNK, up to 4096 lanes
    n_pad = _round_up(n, tb)
    x_p = jnp.pad(x_fm.astype(jnp.float32), ((0, 0), (0, n_pad - n)))

    const2d = lambda i: (0, 0)
    in_specs = [pl.BlockSpec((LAYERS[0], tb), lambda i: (0, i))]
    for p in prepared:
        # Grid-invariant full-array blocks: fetched once, VMEM-resident across tiles.
        in_specs.append(pl.BlockSpec(p.shape, const2d))

    out = pl.pallas_call(
        _pinn_kernel,
        out_shape=jax.ShapeDtypeStruct((LAYERS[-1], n_pad), jnp.float32),
        grid_spec=pltpu.PrefetchScalarGridSpec(
            num_scalar_prefetch=0,
            grid=(n_pad // tb,),
            in_specs=in_specs,
            out_specs=pl.BlockSpec((LAYERS[-1], tb), lambda i: (0, i)),
        ),
        compiler_params=pltpu.CompilerParams(
            dimension_semantics=("parallel",)),
    )(x_p, *prepared)

    return out[:, :n]


@jax.jit
def pinn_forward(x, prepared):
    """Torch-layout forward: x (N, 2) -> (N, 3).

    The two transposes here are wrapper-side XLA HBM passes; for best end-to-end
    performance keep data feature-major and call pinn_forward_fm directly.
    """
    return pinn_forward_fm(x.T, prepared).T


def init_params(key):
    """nn.Linear default init: U(-1/sqrt(fan_in), 1/sqrt(fan_in)) for W and b."""
    params = []
    for i in range(len(LAYERS) - 1):
        fan_in, fan_out = LAYERS[i], LAYERS[i + 1]
        key, kw, kb = jax.random.split(key, 3)
        bound = 1.0 / jnp.sqrt(fan_in)
        w = jax.random.uniform(kw, (fan_out, fan_in), jnp.float32, -bound, bound)
        b = jax.random.uniform(kb, (fan_out,), jnp.float32, -bound, bound)
        params.append((w, b))
    return params


def pinn_ref_f32(x, params):
    """Strict-f32 pure-JAX reference mirroring the torch forward."""
    h = x
    for i, (w, b) in enumerate(params):
        h = jnp.dot(h, w.T, precision=jax.lax.Precision.HIGHEST) + b
        if i < len(params) - 1:
            h = jnp.tanh(h)
    return h


def pinn_ref_bf16(x, params):
    """Pure-JAX reference of the kernel's bf16-operand / f32-accumulate math."""
    h = x.astype(jnp.float32)
    for i, (w, b) in enumerate(params):
        h = jnp.dot(h.astype(jnp.bfloat16),
                    jnp.asarray(w, jnp.float32).astype(jnp.bfloat16).T,
                    preferred_element_type=jnp.float32) + b
        if i < len(params) - 1:
            h = jnp.tanh(h)
    return h


if __name__ == "__main__":
    key = jax.random.PRNGKey(0)
    kp, kx = jax.random.split(key)
    params = init_params(kp)
    prepared = prepare_params(params)

    # Sizes exercise: single 512-lane chunk, multi-chunk single grid step, multi grid step.
    for n in (257, 777, 4500):
        kx, sub = jax.random.split(kx)
        x = jax.random.normal(sub, (n, LAYERS[0]), jnp.float32)

        out = jax.block_until_ready(pinn_forward(x, prepared))
        assert out.shape == (n, LAYERS[-1]), out.shape

        # Tight check against a reference using the same bf16-operand MXU math.
        ref_bf16 = pinn_ref_bf16(x, params)
        err = float(jnp.max(jnp.abs(out - ref_bf16)))
        assert jnp.allclose(out, ref_bf16, atol=1e-4, rtol=1e-4), err

        # Loose check against strict-f32 torch semantics (bf16 MXU operands introduce
        # ~1e-3-level deviation; see perf-review correctness note).
        ref_f32 = pinn_ref_f32(x, params)
        err32 = float(jnp.max(jnp.abs(out - ref_f32)))
        assert jnp.allclose(out, ref_f32, atol=5e-2, rtol=5e-2), err32

        # Transpose-free feature-major entry point gives identical results.
        out_fm = jax.block_until_ready(pinn_forward_fm(x.T, prepared))
        assert jnp.allclose(out_fm.T, out, atol=1e-6, rtol=1e-6)

    print("KERNEL_OK")
</pallas_src>

<mosaic_0001>
module attributes {stable_mosaic.version = 11 : i64} {
  func.func @_pinn_kernel(%arg0: i32, %arg1: memref<2x512xf32, #tpu.memory_space<vmem>>, %arg2: memref<24x2xbf16, #tpu.memory_space<vmem>>, %arg3: memref<24x512xf32, #tpu.memory_space<vmem>>, %arg4: memref<24x24xbf16, #tpu.memory_space<vmem>>, %arg5: memref<24x512xf32, #tpu.memory_space<vmem>>, %arg6: memref<24x24xbf16, #tpu.memory_space<vmem>>, %arg7: memref<24x512xf32, #tpu.memory_space<vmem>>, %arg8: memref<3x24xbf16, #tpu.memory_space<vmem>>, %arg9: memref<3x512xf32, #tpu.memory_space<vmem>>, %arg10: memref<3x512xf32, #tpu.memory_space<vmem>>) attributes {dimension_semantics = [#tpu.dimension_semantics<parallel>], iteration_bounds = array<i64: 1>, scalar_prefetch = 0 : i64, scratch_operands = 0 : i64, tpu.core_type = #tpu.core_type<tc>, window_params = [{transform_indices = @transform_0, window_bounds = array<i64: 2, 512>}, {pipeline_mode = #tpu.pipeline_mode<synchronous>, transform_indices = @transform_1, window_bounds = array<i64: 24, 2>}, {pipeline_mode = #tpu.pipeline_mode<synchronous>, transform_indices = @transform_2, window_bounds = array<i64: 24, 512>}, {pipeline_mode = #tpu.pipeline_mode<synchronous>, transform_indices = @transform_3, window_bounds = array<i64: 24, 24>}, {pipeline_mode = #tpu.pipeline_mode<synchronous>, transform_indices = @transform_4, window_bounds = array<i64: 24, 512>}, {pipeline_mode = #tpu.pipeline_mode<synchronous>, transform_indices = @transform_5, window_bounds = array<i64: 24, 24>}, {pipeline_mode = #tpu.pipeline_mode<synchronous>, transform_indices = @transform_6, window_bounds = array<i64: 24, 512>}, {pipeline_mode = #tpu.pipeline_mode<synchronous>, transform_indices = @transform_7, window_bounds = array<i64: 3, 24>}, {pipeline_mode = #tpu.pipeline_mode<synchronous>, transform_indices = @transform_8, window_bounds = array<i64: 3, 512>}, {transform_indices = @transform_9, window_bounds = array<i64: 3, 512>}]} {
    %c0_i32 = arith.constant 0 : i32
    %c512_i32 = arith.constant 512 : i32
    %0 = arith.muli %c0_i32, %c512_i32 : i32
    %1 = tpu.assume_multiple %0, 512 : i32
    %c0 = arith.constant 0 : index
    %2 = arith.index_cast %1 : i32 to index
    %3 = vector.load %arg1[%c0, %2] : memref<2x512xf32, #tpu.memory_space<vmem>>, vector<2x512xf32>
    %4 = arith.truncf %3 : vector<2x512xf32> to vector<2x512xbf16>
    %c0_0 = arith.constant 0 : index
    %c0_1 = arith.constant 0 : index
    %5 = vector.load %arg2[%c0_0, %c0_1] : memref<24x2xbf16, #tpu.memory_space<vmem>>, vector<24x2xbf16>
    %cst = arith.constant dense<0.000000e+00> : vector<24x512xf32>
    %6 = tpu.matmul %5, %4, %cst {dimension_numbers = #tpu.dot_dimension_numbers<[1], [0], [0], [1], [0, 0, 1, 1], [], []>} : vector<24x2xbf16>, vector<2x512xbf16>, vector<24x512xf32> -> vector<24x512xf32>
    %c0_2 = arith.constant 0 : index
    %c0_3 = arith.constant 0 : index
    %7 = vector.load %arg3[%c0_2, %c0_3] : memref<24x512xf32, #tpu.memory_space<vmem>>, vector<24x512xf32>
    %8 = arith.addf %6, %7 : vector<24x512xf32>
    %9 = math.tanh %8 : vector<24x512xf32>
    %10 = arith.truncf %9 : vector<24x512xf32> to vector<24x512xbf16>
    %c0_4 = arith.constant 0 : index
    %c0_5 = arith.constant 0 : index
    %11 = vector.load %arg4[%c0_4, %c0_5] : memref<24x24xbf16, #tpu.memory_space<vmem>>, vector<24x24xbf16>
    %cst_6 = arith.constant dense<0.000000e+00> : vector<24x512xf32>
    %12 = tpu.matmul %11, %10, %cst_6 {dimension_numbers = #tpu.dot_dimension_numbers<[1], [0], [0], [1], [0, 0, 1, 1], [], []>} : vector<24x24xbf16>, vector<24x512xbf16>, vector<24x512xf32> -> vector<24x512xf32>
    %c0_7 = arith.constant 0 : index
    %c0_8 = arith.constant 0 : index
    %13 = vector.load %arg5[%c0_7, %c0_8] : memref<24x512xf32, #tpu.memory_space<vmem>>, vector<24x512xf32>
    %14 = arith.addf %12, %13 : vector<24x512xf32>
    %15 = math.tanh %14 : vector<24x512xf32>
    %16 = arith.truncf %15 : vector<24x512xf32> to vector<24x512xbf16>
    %c0_9 = arith.constant 0 : index
    %c0_10 = arith.constant 0 : index
    %17 = vector.load %arg6[%c0_9, %c0_10] : memref<24x24xbf16, #tpu.memory_space<vmem>>, vector<24x24xbf16>
    %cst_11 = arith.constant dense<0.000000e+00> : vector<24x512xf32>
    %18 = tpu.matmul %17, %16, %cst_11 {dimension_numbers = #tpu.dot_dimension_numbers<[1], [0], [0], [1], [0, 0, 1, 1], [], []>} : vector<24x24xbf16>, vector<24x512xbf16>, vector<24x512xf32> -> vector<24x512xf32>
    %c0_12 = arith.constant 0 : index
    %c0_13 = arith.constant 0 : index
    %19 = vector.load %arg7[%c0_12, %c0_13] : memref<24x512xf32, #tpu.memory_space<vmem>>, vector<24x512xf32>
    %20 = arith.addf %18, %19 : vector<24x512xf32>
    %21 = math.tanh %20 : vector<24x512xf32>
    %22 = arith.truncf %21 : vector<24x512xf32> to vector<24x512xbf16>
    %c0_14 = arith.constant 0 : index
    %c0_15 = arith.constant 0 : index
    %23 = vector.load %arg8[%c0_14, %c0_15] : memref<3x24xbf16, #tpu.memory_space<vmem>>, vector<3x24xbf16>
    %cst_16 = arith.constant dense<0.000000e+00> : vector<3x512xf32>
    %24 = tpu.matmul %23, %22, %cst_16 {dimension_numbers = #tpu.dot_dimension_numbers<[1], [0], [0], [1], [0, 0, 1, 1], [], []>} : vector<3x24xbf16>, vector<24x512xbf16>, vector<3x512xf32> -> vector<3x512xf32>
    %c0_17 = arith.constant 0 : index
    %c0_18 = arith.constant 0 : index
    %25 = vector.load %arg9[%c0_17, %c0_18] : memref<3x512xf32, #tpu.memory_space<vmem>>, vector<3x512xf32>
    %26 = arith.addf %24, %25 : vector<3x512xf32>
    %c0_19 = arith.constant 0 : index
    %27 = arith.index_cast %1 : i32 to index
    %28 = vector.load %arg10[%c0_19, %27] : memref<3x512xf32, #tpu.memory_space<vmem>>, vector<3x512xf32>
    tpu.vector_store %arg10[%c0_19, %27], %26 {strides = array<i32>} : memref<3x512xf32, #tpu.memory_space<vmem>>, vector<3x512xf32>,
    %c1_i32 = arith.constant 1 : i32
    return
  }
  func.func @transform_0(%arg0: i32) -> (i32, i32) {
    %c0_i32 = arith.constant 0 : i32
    %c0_i32_0 = arith.constant 0 : i32
    return %c0_i32, %arg0 : i32, i32
  }
  func.func @transform_1(%arg0: i32) -> (i32, i32) {
    %c0_i32 = arith.constant 0 : i32
    %c0_i32_0 = arith.constant 0 : i32
    %c0_i32_1 = arith.constant 0 : i32
    return %c0_i32, %c0_i32_0 : i32, i32
  }
  func.func @transform_2(%arg0: i32) -> (i32, i32) {
    %c0_i32 = arith.constant 0 : i32
    %c0_i32_0 = arith.constant 0 : i32
    %c0_i32_1 = arith.constant 0 : i32
    return %c0_i32, %c0_i32_0 : i32, i32
  }
  func.func @transform_3(%arg0: i32) -> (i32, i32) {
    %c0_i32 = arith.constant 0 : i32
    %c0_i32_0 = arith.constant 0 : i32
    %c0_i32_1 = arith.constant 0 : i32
    return %c0_i32, %c0_i32_0 : i32, i32
  }
  func.func @transform_4(%arg0: i32) -> (i32, i32) {
    %c0_i32 = arith.constant 0 : i32
    %c0_i32_0 = arith.constant 0 : i32
    %c0_i32_1 = arith.constant 0 : i32
    return %c0_i32, %c0_i32_0 : i32, i32
  }
  func.func @transform_5(%arg0: i32) -> (i32, i32) {
    %c0_i32 = arith.constant 0 : i32
    %c0_i32_0 = arith.constant 0 : i32
    %c0_i32_1 = arith.constant 0 : i32
    return %c0_i32, %c0_i32_0 : i32, i32
  }
  func.func @transform_6(%arg0: i32) -> (i32, i32) {
    %c0_i32 = arith.constant 0 : i32
    %c0_i32_0 = arith.constant 0 : i32
    %c0_i32_1 = arith.constant 0 : i32
    return %c0_i32, %c0_i32_0 : i32, i32
  }
  func.func @transform_7(%arg0: i32) -> (i32, i32) {
    %c0_i32 = arith.constant 0 : i32
    %c0_i32_0 = arith.constant 0 : i32
    %c0_i32_1 = arith.constant 0 : i32
    return %c0_i32, %c0_i32_0 : i32, i32
  }
  func.func @transform_8(%arg0: i32) -> (i32, i32) {
    %c0_i32 = arith.constant 0 : i32
    %c0_i32_0 = arith.constant 0 : i32
    %c0_i32_1 = arith.constant 0 : i32
    return %c0_i32, %c0_i32_0 : i32, i32
  }
  func.func @transform_9(%arg0: i32) -> (i32, i32) {
    %c0_i32 = arith.constant 0 : i32
    %c0_i32_0 = arith.constant 0 : i32
    return %c0_i32, %arg0 : i32, i32
  }
}

</mosaic_0001>

<bundles_post_ra>
// kernel: pinn_forward_fm.1
= control target key start
LH: loop header
LB: loop body
LE: loop exit
PB: predicated region body
PF: predicated region fallthrough
CT: control target
= control target key end

     0   :  { %14 = vsyncpa [#allocation3], 0  ;;  %s1083_s0 = inlined_call_operand.vmem [shape: f32[2,512], index: 0, kind: input, shape index: {}]   ;;  %s1084_s1 = inlined_call_operand.vmem [shape: bf16[24,2], index: 1, kind: input, shape index: {}]   ;;  %s1085_s2 = inlined_call_operand.hbm [shape: f32[24,512], index: 2, kind: input, shape index: {}]   ;;  %s1086_s3 = inlined_call_operand.vmem [shape: bf16[24,24], index: 3, kind: input, shape index: {}]   ;;  %s1087_s4 = inlined_call_operand.hbm [shape: f32[24,512], index: 4, kind: input, shape index: {}]   ;;  %s1088_s5 = inlined_call_operand.vmem [shape: bf16[24,24], index: 5, kind: input, shape index: {}]   ;;  %s1089_s6 = inlined_call_operand.hbm [shape: f32[24,512], index: 6, kind: input, shape index: {}]   ;;  %s1090_s7 = inlined_call_operand.vmem [shape: bf16[3,24], index: 7, kind: input, shape index: {}]   ;;  %s1091_s8 = inlined_call_operand.vmem [shape: f32[3,512], index: 8, kind: input, shape index: {}]   ;;  %s1092_s9 = inlined_call_operand.vmem [shape: f32[3,512], index: 9, kind: output, shape index: {}]  }
   0x1   :  { %15 = vsyncpa [#allocation5], 0  ;;  %s902_s30 = smov [#allocation4]   ;;  %s903_s11 = smov [#allocation2]  }
   0x2   :  { %s39_s10 = sshll.u32 %s902_s30, 4  ;;  %s25_s12 = sshll.u32 %s903_s11, 4  ;;  %s40_s10 = int_to_ptr.vmem [resolvable:$true] %s39_s10  ;;  %s959_s12 = int_to_ptr.vmem [resolvable:$true] %s25_s12 }
   0x3   :  { %s832_s15 = scalar_lea.hbm %s1087_s4, 1536 }
   0x4   :  { %p833_p0 = scmp.ne.s32.totalorder %s1087_s4, %s832_s15  ;;  %p836_p1 = scmp.lt.u32.totalorder %s832_s15, %s1087_s4 }
   0x6   :  { %p838_p2 = pnand %p836_p1, %p833_p0 }
   0x8   :  { %841 = shalt.err (!%p838_p2)
}
   0x9   :  { %s842_s20 = scalar_lea.vmem %s40_s10, 1536  ;;  %p847_p4 = scmp.lt.s32.totalorder %s40_s10, %s40_s10 }
   0xa   :  { %p843_p3 = scmp.ne.s32.totalorder %s40_s10, %s842_s20  ;;  %p848_p5 = scmp.lt.s32.totalorder %s842_s20, %s842_s20 }
   0xc   :  { %p849_p6 = por %p848_p5, %p847_p4 }
   0xe   :  { %p850_p7 = pnand %p849_p6, %p843_p3 }
  0x10   :  { %853 = shalt.err (!%p850_p7)
}
  0x11   :  { %s904_s21 = smov 512   ;;  %s905_s22 = smov 32  }
  0x12   :  { %45 = dma.hbm_to_vmem [thread:$0]  %s1087_s4, 1536, %s40_s10, [#allocation5], %s904_s21, %s904_s21, %s905_s22  }
  0x13   :  { %s854_s27 = scalar_lea.hbm %s1085_s2, 1536 }
  0x14   :  { %p855_p8 = scmp.ne.s32.totalorder %s1085_s2, %s854_s27  ;;  %p858_p9 = scmp.lt.u32.totalorder %s854_s27, %s1085_s2 }
  0x16   :  { %p860_p10 = pnand %p858_p9, %p855_p8 }
  0x18   :  { %863 = shalt.err (!%p860_p10)
}
  0x19   :  { %s864_s13 = scalar_lea.vmem %s959_s12, 1536  ;;  %p869_p12 = scmp.lt.s32.totalorder %s959_s12, %s959_s12 }
  0x1a   :  { %p865_p11 = scmp.ne.s32.totalorder %s959_s12, %s864_s13  ;;  %p870_p13 = scmp.lt.s32.totalorder %s864_s13, %s864_s13 }
  0x1c   :  { %p871_p0 = por %p870_p13, %p869_p12 }
  0x1e   :  { %p872_p1 = pnand %p871_p0, %p865_p11 }
  0x20   :  { %875 = shalt.err (!%p872_p1)
}
  0x21   :  { %31 = dma.hbm_to_vmem [thread:$0]  %s1085_s2, 1536, %s959_s12, [#allocation3], %s904_s21, %s904_s21, %s905_s22  }
  0x22   :  { %s906_s14 = smov [#allocation6]   ;;  %s876_s18 = scalar_lea.hbm %s1089_s6, 1536 }
  0x23   :  { %s53_s15 = sshll.u32 %s906_s14, 4  ;;  %p877_p2 = scmp.ne.s32.totalorder %s1089_s6, %s876_s18  ;;  %s54_s15 = int_to_ptr.vmem [resolvable:$true] %s53_s15 }
  0x24   :  { %p880_p3 = scmp.lt.u32.totalorder %s876_s18, %s1089_s6 }
  0x26   :  { %p882_p4 = pnand %p880_p3, %p877_p2 }
  0x28   :  { %885 = shalt.err (!%p882_p4)
}
  0x29   :  { %s886_s25 = scalar_lea.vmem %s54_s15, 1536  ;;  %p891_p6 = scmp.lt.s32.totalorder %s54_s15, %s54_s15 }
  0x2a   :  { %p887_p5 = scmp.ne.s32.totalorder %s54_s15, %s886_s25  ;;  %p892_p7 = scmp.lt.s32.totalorder %s886_s25, %s886_s25 }
  0x2c   :  { %p893_p8 = por %p892_p7, %p891_p6 }
  0x2e   :  { %p894_p9 = pnand %p893_p8, %p887_p5 }
  0x30   :  { %897 = shalt.err (!%p894_p9)
}
  0x31   :  { %59 = dma.hbm_to_vmem [thread:$0]  %s1089_s6, 1536, %s54_s15, [#allocation5], %s904_s21, %s904_s21, %s905_s22  }
  0x32   :  { %898 = dma.done.wait [#allocation3], 1536  }
  0x33   :  { %899 = vsyncadd [#allocation3], 4294965760 }
  0x34   :  { %900 = dma.done.wait [#allocation5], 3072  }
  0x35   :  { %901 = vsyncadd [#allocation5], 4294964224  ;;  %v80_v0 = vlaneseq  ;;  %v907_v1 = vmov 1983009808   ;;  %v908_v3 = vmov 0   ;;  %v74_v7 = vld [vmem:[%s1083_s0] sm:$0xff] }
  0x36   :  { %v78_v2 = vunpack.c.l.s4 %v907_v1  ;;  %176 = vmatprep.mubr.bf16.mxu0 %v908_v3  ;;  %227 = vmatprep.mubr.bf16.mxu1 %v908_v3  ;;  %v76_v9 = vcombine.high %v74_v7, %v74_v7  ;;  %vm131_vm0 = vcmask 1040384   ;;  %v752_v19 = vld [vmem:[%s1084_s1] sm:$0xff]   ;;  %vm124_vm1 = vcmask 15360   ;;  %v753_v20 = vld [vmem:[%s1084_s1 + $0x8] ss:$0 sps:$4 sm:$0xff]   ;;  %v106_v25 = vld [vmem:[#allocation2 + $0x10] sm:$0xff] }
  0x37   :  { %v81_v4 = vshrl.u32 %v80_v0, 7  ;;  %v104_v21 = vld [vmem:[#allocation2] sm:$0xff]  ;;  %v105_v22 = vld [vmem:[#allocation2 + $0x8] sm:$0xff]  ;;  %v107_v29 = vld [vmem:[#allocation2 + $0x18] sm:$0xff]  ;;  %vm296_vm2 = vcmask 1043456   ;;  %vm289_vm3 = vcmask 195584  }
  0x38   :  { %v79_v5 = vunpack.c.0.s8 %v78_v2  ;;  %v108_v24 = vld [vmem:[#allocation2 + $0x20] sm:$0xff]  ;;  %v109_v28 = vld [vmem:[#allocation2 + $0x28] sm:$0xff]  ;;  %v110_v33 = vld [vmem:[#allocation2 + $0x30] sm:$0xff] }
  0x39   :  { %v111_v38 = vld [vmem:[#allocation2 + $0x38] sm:$0xff]  ;;  %v112_v45 = vld [vmem:[#allocation2 + $0x40] sm:$0xff]  ;;  %v113_v46 = vld [vmem:[#allocation2 + $0x48] sm:$0xff] }
  0x3a   :  { %v82_v6 = vsub.s32 %v79_v5, %v81_v4  ;;  %v114_v48 = vld [vmem:[#allocation2 + $0x50] sm:$0xff]  ;;  %v115_v51 = vld [vmem:[#allocation2 + $0x58] sm:$0xff] }
  0x3c   :  { %v83_v8 = vrot.slane %v74_v7, %v82_v6  ;;  %v90_v12 = vrot.slane %v76_v9, %v82_v6 }
  0x3e   :  { %v91_v10 = vcombine.high %v83_v8, %v83_v8  ;;  %v97_v11 = vpack.c.bf16 %v83_v8, %v83_v8  ;;  %v92_v15 = vcombine.high %v90_v12, %v90_v12  ;;  %v99_v16 = vpack.c.bf16 %v90_v12, %v90_v12 }
  0x40   :  { %v98_v13 = vpack.c.bf16 %v91_v10, %v91_v10  ;;  %v133_v14 = vsel %vm131_vm0, %v97_v11, 0  ;;  %v100_v17 = vpack.c.bf16 %v92_v15, %v92_v15  ;;  %v139_v18 = vsel %vm131_vm0, %v99_v16, 0 }
  0x42   :  { %718 = vmatprep.subr.msk.bf16.mxu0 %vm131_vm0, %v98_v13  ;;  %721 = vmatprep.subr.msk.bf16.mxu1 %vm131_vm0, %v100_v17 }
  0x43   :  { %145 = vmatpush1.bf16.msra.mxu0 %v133_v14  ;;  %196 = vmatpush1.bf16.msra.mxu1 %v139_v18 }
  0x46   :  { %719 = vmatmul.mubr.msk.bf16.vlgmr.msra.gmra.mrb[0].mxu0 %vm124_vm1, %v752_v19  ;;  %722 = vmatmul.mubr.msk.bf16.vlgmr.msra.gmra.mrb[0].mxu1 %vm124_vm1, %v752_v19  ;;  %v754_v19 = vld [vmem:[%s1086_s3] sm:$0xff]  }
  0x47   :  { %186 = vmatprep.mubr.bf16.mxu0 %v908_v3  ;;  %237 = vmatprep.mubr.bf16.mxu1 %v908_v3 }
  0x4e   :  { %720 = vmatmul.mubr.msk.bf16.gmra.mrb[4].mxu0 %vm124_vm1, %v753_v20  ;;  %723 = vmatmul.mubr.msk.bf16.gmra.mrb[4].mxu1 %vm124_vm1, %v753_v20 }
  0x4f   :  { %341 = vmatprep.mubr.bf16.mxu0 %v908_v3  ;;  %392 = vmatprep.mubr.bf16.mxu1 %v908_v3 }
 0x119   :  { %v178_v23 = vpop.f32.mrb[0].mxu0  ;;  %v229_v32 = vpop.f32.mrb[0].mxu1 }
 0x11a   :  { %v179_v26 = vadd.f32 %v178_v23, %v104_v21  ;;  %v180_v27 = vpop.f32.mrb[1].mxu0  ;;  %v230_v35 = vadd.f32 %v229_v32, %v106_v25  ;;  %v231_v37 = vpop.f32.mrb[1].mxu1  ;;  %v755_v21 = vld [vmem:[%s1086_s3 + $0x8] ss:$0 sps:$4 sm:$0xff]   ;;  %v273_v25 = vld [vmem:[#allocation4 + $0x20] sm:$0xff] }
 0x11b   :  { %v181_v30 = vadd.f32 %v180_v27, %v105_v22  ;;  %v182_v31 = vpop.f32.mrb[2].mxu0  ;;  %v232_v40 = vadd.f32 %v231_v37, %v107_v29  ;;  %v233_v41 = vpop.f32.mrb[2].mxu1  ;;  %v269_v22 = vld [vmem:[#allocation4] sm:$0xff]  ;;  %v270_v23 = vld [vmem:[#allocation4 + $0x8] sm:$0xff] }
 0x11c   :  { %760 = vtanh.f32 %v179_v26  ;;  %v183_v34 = vadd.f32 %v182_v31, %v108_v24  ;;  %v184_v36 = vpop.f32.mrb[3].mxu0  ;;  %v234_v42 = vadd.f32 %v233_v41, %v110_v33  ;;  %v235_v43 = vpop.f32.mrb[3].mxu1  ;;  %v271_v26 = vld [vmem:[#allocation4 + $0x10] sm:$0xff]  ;;  %v274_v29 = vld [vmem:[#allocation4 + $0x28] sm:$0xff] }
 0x11d   :  { %762 = vtanh.f32 %v181_v30  ;;  %v185_v39 = vadd.f32 %v184_v36, %v109_v28  ;;  %v236_v44 = vadd.f32 %v235_v43, %v111_v38  ;;  %v272_v30 = vld [vmem:[#allocation4 + $0x18] sm:$0xff] }
 0x11e   :  { %764 = vtanh.f32 %v183_v34  ;;  %v275_v34 = vld [vmem:[#allocation4 + $0x30] sm:$0xff] }
 0x11f   :  { %766 = vtanh.f32 %v230_v35 }
 0x120   :  { %768 = vtanh.f32 %v185_v39  ;;  %v276_v39 = vld [vmem:[#allocation4 + $0x38] sm:$0xff] }
 0x121   :  { %770 = vtanh.f32 %v232_v40  ;;  %v188_v47 = vpop.f32.mrb[4].mxu0  ;;  %v239_v54 = vpop.f32.mrb[4].mxu1 }
 0x122   :  { %772 = vtanh.f32 %v234_v42  ;;  %v189_v49 = vadd.f32 %v188_v47, %v112_v45  ;;  %v190_v50 = vpop.f32.mrb[5].mxu0  ;;  %v240_v55 = vadd.f32 %v239_v54, %v114_v48  ;;  %v241_v57 = vpop.f32.mrb[5].mxu1  ;;  %v278_v47 = vld [vmem:[#allocation4 + $0x48] sm:$0xff] }
 0x123   :  { %774 = vtanh.f32 %v236_v44  ;;  %v191_v52 = vadd.f32 %v190_v50, %v113_v46  ;;  %v192_v53 = vpop.f32.mrb[6].mxu0  ;;  %v242_v58 = vadd.f32 %v241_v57, %v115_v51  ;;  %v243_v59 = vpop.f32.mrb[6].mxu1  ;;  %v277_v46 = vld [vmem:[#allocation4 + $0x40] sm:$0xff] }
 0x124   :  { %776 = vtanh.f32 %v189_v49  ;;  %v193_v56 = vpop.f32.mrb[7].mxu0  ;;  %v244_v61 = vpop.f32.mrb[7].mxu1  ;;  %v279_v49 = vld [vmem:[#allocation4 + $0x50] sm:$0xff] }
 0x125   :  { %778 = vtanh.f32 %v191_v52  ;;  %v280_v52 = vld [vmem:[#allocation4 + $0x58] sm:$0xff] }
 0x126   :  { %v761_v60 = vpop.eup %760  ;;  %780 = vtanh.f32 %v240_v55 }
 0x127   :  { %v763_v62 = vpop.eup %762  ;;  %782 = vtanh.f32 %v242_v58 }
 0x128   :  { %v765_v63 = vpop.eup %764 }
 0x129   :  { %v767_v0 = vpop.eup %766  ;;  %v258_v1 = vpack.c.bf16 %v765_v63, %v761_v60 }
 0x12a   :  { %v769_v2 = vpop.eup %768 }
 0x12b   :  { %v771_v4 = vpop.eup %770  ;;  %v259_v5 = vpack.c.bf16 %v769_v2, %v763_v62 }
 0x12c   :  { %v773_v6 = vpop.eup %772 }
 0x12d   :  { %v775_v7 = vpop.eup %774  ;;  %309 = vmatprep.subr.bf16.mxu0 %v259_v5  ;;  %v260_v8 = vpack.c.bf16 %v773_v6, %v767_v0 }
 0x12e   :  { %v777_v9 = vpop.eup %776  ;;  %310 = vmatpush1.bf16.msra.mxu0 %v258_v1  ;;  %v261_v10 = vpack.c.bf16 %v775_v7, %v771_v4 }
 0x12f   :  { %v779_v11 = vpop.eup %778  ;;  %v262_v12 = vpack.c.bf16 %v777_v9, %v777_v9 }
 0x130   :  { %v781_v13 = vpop.eup %780  ;;  %v263_v14 = vpack.c.bf16 %v779_v11, %v779_v11  ;;  %360 = vmatprep.subr.bf16.mxu1 %v261_v10 }
 0x131   :  { %v783_v15 = vpop.eup %782  ;;  %v264_v16 = vpack.c.bf16 %v781_v13, %v781_v13  ;;  %361 = vmatpush1.bf16.msra.mxu1 %v260_v8  ;;  %v298_v17 = vsel %vm296_vm2, %v262_v12, 0 }
 0x132   :  { %v265_v18 = vpack.c.bf16 %v783_v15, %v783_v15  ;;  %726 = vmatprep.subr.msk.bf16.mxu0 %vm296_vm2, %v263_v14 }
 0x133   :  { %312 = vmatpush1.bf16.msra.mxu0 %v298_v17  ;;  %v304_v20 = vsel %vm296_vm2, %v264_v16, 0 }
 0x134   :  { %729 = vmatprep.subr.msk.bf16.mxu1 %vm296_vm2, %v265_v18 }
 0x135   :  { %363 = vmatpush1.bf16.msra.mxu1 %v304_v20  ;;  %v756_v20 = vld [vmem:[%s1088_s5] sm:$0xff]  }
 0x136   :  { %727 = vmatmul.mubr.msk.bf16.vlgmr.msra.gmra.mrb[8].mxu0 %vm289_vm3, %v754_v19 }
 0x137   :  { %351 = vmatprep.mubr.bf16.mxu0 %v908_v3 }
 0x138   :  { %730 = vmatmul.mubr.msk.bf16.vlgmr.msra.gmra.mrb[8].mxu1 %vm289_vm3, %v754_v19 }
 0x139   :  { %402 = vmatprep.mubr.bf16.mxu1 %v908_v3 }
 0x13e   :  { %728 = vmatmul.mubr.msk.bf16.gmra.mrb[12].mxu0 %vm289_vm3, %v755_v21 }
 0x13f   :  { %504 = vmatprep.mubr.bf16.mxu0 %v908_v3 }
 0x140   :  { %731 = vmatmul.mubr.msk.bf16.gmra.mrb[12].mxu1 %vm289_vm3, %v755_v21 }
 0x141   :  { %555 = vmatprep.mubr.bf16.mxu1 %v908_v3 }
 0x209   :  { %v343_v24 = vpop.f32.mrb[8].mxu0 }
 0x20a   :  { %v344_v27 = vadd.f32 %v343_v24, %v269_v22  ;;  %v345_v28 = vpop.f32.mrb[9].mxu0  ;;  %v757_v22 = vld [vmem:[%s1088_s5 + $0x8] ss:$0 sps:$4 sm:$0xff]  }
 0x20b   :  { %v346_v31 = vadd.f32 %v345_v28, %v270_v23  ;;  %v347_v32 = vpop.f32.mrb[10].mxu0  ;;  %v394_v33 = vpop.f32.mrb[8].mxu1  ;;  %v434_v23 = vld [vmem:[#allocation6] sm:$0xff]  ;;  %v435_v24 = vld [vmem:[#allocation6 + $0x8] sm:$0xff] }
 0x20c   :  { %784 = vtanh.f32 %v344_v27  ;;  %v348_v35 = vadd.f32 %v347_v32, %v273_v25  ;;  %v395_v36 = vadd.f32 %v394_v33, %v271_v26  ;;  %v349_v37 = vpop.f32.mrb[11].mxu0  ;;  %v396_v38 = vpop.f32.mrb[9].mxu1  ;;  %v438_v26 = vld [vmem:[#allocation6 + $0x20] sm:$0xff]  ;;  %v436_v27 = vld [vmem:[#allocation6 + $0x10] sm:$0xff] }
 0x20d   :  { %786 = vtanh.f32 %v346_v31  ;;  %v350_v40 = vadd.f32 %v349_v37, %v274_v29  ;;  %v397_v41 = vadd.f32 %v396_v38, %v272_v30  ;;  %v398_v42 = vpop.f32.mrb[10].mxu1  ;;  %v439_v30 = vld [vmem:[#allocation6 + $0x28] sm:$0xff]  ;;  %v437_v31 = vld [vmem:[#allocation6 + $0x18] sm:$0xff] }
 0x20e   :  { %788 = vtanh.f32 %v348_v35  ;;  %v399_v43 = vadd.f32 %v398_v42, %v275_v34  ;;  %v400_v44 = vpop.f32.mrb[11].mxu1  ;;  %v440_v35 = vld [vmem:[#allocation6 + $0x30] sm:$0xff] }
 0x20f   :  { %790 = vtanh.f32 %v395_v36  ;;  %v401_v45 = vadd.f32 %v400_v44, %v276_v39 }
 0x210   :  { %792 = vtanh.f32 %v350_v40  ;;  %v441_v40 = vld [vmem:[#allocation6 + $0x38] sm:$0xff] }
 0x211   :  { %794 = vtanh.f32 %v397_v41  ;;  %v353_v48 = vpop.f32.mrb[12].mxu0 }
 0x212   :  { %796 = vtanh.f32 %v399_v43  ;;  %v354_v50 = vadd.f32 %v353_v48, %v277_v46  ;;  %v355_v51 = vpop.f32.mrb[13].mxu0  ;;  %v442_v46 = vld [vmem:[#allocation6 + $0x40] sm:$0xff] }
 0x213   :  { %798 = vtanh.f32 %v401_v45  ;;  %v356_v53 = vadd.f32 %v355_v51, %v278_v47  ;;  %v357_v54 = vpop.f32.mrb[14].mxu0  ;;  %v404_v55 = vpop.f32.mrb[12].mxu1  ;;  %v443_v47 = vld [vmem:[#allocation6 + $0x48] sm:$0xff] }
 0x214   :  { %800 = vtanh.f32 %v354_v50  ;;  %v405_v56 = vadd.f32 %v404_v55, %v279_v49  ;;  %v358_v57 = vpop.f32.mrb[15].mxu0  ;;  %v406_v58 = vpop.f32.mrb[13].mxu1  ;;  %v444_v49 = vld [vmem:[#allocation6 + $0x50] sm:$0xff] }
 0x215   :  { %802 = vtanh.f32 %v356_v53  ;;  %v407_v59 = vadd.f32 %v406_v58, %v280_v52  ;;  %v408_v60 = vpop.f32.mrb[14].mxu1  ;;  %v445_v52 = vld [vmem:[#allocation6 + $0x58] sm:$0xff] }
 0x216   :  { %v785_v61 = vpop.eup %784  ;;  %804 = vtanh.f32 %v405_v56  ;;  %v409_v62 = vpop.f32.mrb[15].mxu1 }
 0x217   :  { %v787_v63 = vpop.eup %786  ;;  %806 = vtanh.f32 %v407_v59 }
 0x218   :  { %v789_v0 = vpop.eup %788 }
 0x219   :  { %v791_v1 = vpop.eup %790  ;;  %v423_v2 = vpack.c.bf16 %v789_v0, %v785_v61 }
 0x21a   :  { %v793_v4 = vpop.eup %792 }
 0x21b   :  { %v795_v5 = vpop.eup %794  ;;  %v424_v6 = vpack.c.bf16 %v793_v4, %v787_v63 }
 0x21c   :  { %v797_v7 = vpop.eup %796 }
 0x21d   :  { %v799_v8 = vpop.eup %798  ;;  %472 = vmatprep.subr.bf16.mxu0 %v424_v6  ;;  %v425_v9 = vpack.c.bf16 %v797_v7, %v791_v1 }
 0x21e   :  { %v801_v10 = vpop.eup %800  ;;  %473 = vmatpush1.bf16.msra.mxu0 %v423_v2  ;;  %v426_v11 = vpack.c.bf16 %v799_v8, %v795_v5 }
 0x21f   :  { %v803_v12 = vpop.eup %802  ;;  %v427_v13 = vpack.c.bf16 %v801_v10, %v801_v10 }
 0x220   :  { %v805_v14 = vpop.eup %804  ;;  %v428_v15 = vpack.c.bf16 %v803_v12, %v803_v12  ;;  %523 = vmatprep.subr.bf16.mxu1 %v426_v11 }
 0x221   :  { %v807_v16 = vpop.eup %806  ;;  %v429_v17 = vpack.c.bf16 %v805_v14, %v805_v14  ;;  %524 = vmatpush1.bf16.msra.mxu1 %v425_v9  ;;  %v461_v18 = vsel %vm296_vm2, %v427_v13, 0 }
 0x222   :  { %v430_v19 = vpack.c.bf16 %v807_v16, %v807_v16  ;;  %734 = vmatprep.subr.msk.bf16.mxu0 %vm296_vm2, %v428_v15 }
 0x223   :  { %475 = vmatpush1.bf16.msra.mxu0 %v461_v18  ;;  %v467_v21 = vsel %vm296_vm2, %v429_v17, 0 }
 0x224   :  { %737 = vmatprep.subr.msk.bf16.mxu1 %vm296_vm2, %v430_v19 }
 0x225   :  { %526 = vmatpush1.bf16.msra.mxu1 %v467_v21  ;;  %v594_v21 = vld [vmem:[%s1090_s7] sm:$0x3] }
 0x226   :  { %735 = vmatmul.mubr.msk.bf16.vlgmr.msra.gmra.mrb[16].mxu0 %vm289_vm3, %v756_v20 }
 0x227   :  { %514 = vmatprep.mubr.bf16.mxu0 %v908_v3 }
 0x228   :  { %738 = vmatmul.mubr.msk.bf16.vlgmr.msra.gmra.mrb[16].mxu1 %vm289_vm3, %v756_v20 }
 0x229   :  { %565 = vmatprep.mubr.bf16.mxu1 %v908_v3 }
 0x22e   :  { %736 = vmatmul.mubr.msk.bf16.gmra.mrb[20].mxu0 %vm289_vm3, %v757_v22 }
 0x22f   :  { %650 = vmatprep.mubr.bf16.mxu0 %v908_v3 }
 0x230   :  { %739 = vmatmul.mubr.msk.bf16.gmra.mrb[20].mxu1 %vm289_vm3, %v757_v22  ;;  %v595_v22 = vld [vmem:[%s1091_s8] sm:$0x77] }
 0x231   :  { %691 = vmatprep.mubr.bf16.mxu1 %v908_v3 }
 0x2f9   :  { %v506_v25 = vpop.f32.mrb[16].mxu0 }
 0x2fa   :  { %v507_v28 = vadd.f32 %v506_v25, %v434_v23  ;;  %v508_v29 = vpop.f32.mrb[17].mxu0  ;;  %v596_v23 = vld [vmem:[%s1091_s8 + $0x8] sm:$0x77] }
 0x2fb   :  { %v509_v32 = vadd.f32 %v508_v29, %v435_v24  ;;  %v510_v33 = vpop.f32.mrb[18].mxu0  ;;  %v557_v34 = vpop.f32.mrb[16].mxu1  ;;  %v599_v24 = vcombine.high %v595_v22, %v595_v22 }
 0x2fc   :  { %808 = vtanh.f32 %v507_v28  ;;  %v511_v36 = vadd.f32 %v510_v33, %v438_v26  ;;  %v558_v37 = vadd.f32 %v557_v34, %v436_v27  ;;  %v512_v38 = vpop.f32.mrb[19].mxu0  ;;  %v559_v39 = vpop.f32.mrb[17].mxu1  ;;  %v600_v26 = vcombine.high %v596_v23, %v596_v23 }
 0x2fd   :  { %810 = vtanh.f32 %v509_v32  ;;  %v513_v3 = vadd.f32 %v512_v38, %v439_v30  ;;  %v560_v41 = vadd.f32 %v559_v39, %v437_v31  ;;  %v561_v42 = vpop.f32.mrb[18].mxu1 }
 0x2fe   :  { %812 = vtanh.f32 %v511_v36  ;;  %v562_v43 = vadd.f32 %v561_v42, %v440_v35  ;;  %v563_v44 = vpop.f32.mrb[19].mxu1 }
 0x2ff   :  { %814 = vtanh.f32 %v558_v37  ;;  %v564_v45 = vadd.f32 %v563_v44, %v441_v40 }
 0x300   :  { %816 = vtanh.f32 %v513_v3 }
 0x301   :  { %818 = vtanh.f32 %v560_v41  ;;  %v516_v48 = vpop.f32.mrb[20].mxu0 }
 0x302   :  { %820 = vtanh.f32 %v562_v43  ;;  %v517_v50 = vadd.f32 %v516_v48, %v442_v46  ;;  %v518_v51 = vpop.f32.mrb[21].mxu0 }
 0x303   :  { %822 = vtanh.f32 %v564_v45  ;;  %v519_v53 = vadd.f32 %v518_v51, %v443_v47  ;;  %v567_v54 = vpop.f32.mrb[20].mxu1  ;;  %v520_v55 = vpop.f32.mrb[22].mxu0 }
 0x304   :  { %824 = vtanh.f32 %v517_v50  ;;  %v568_v56 = vadd.f32 %v567_v54, %v444_v49  ;;  %v569_v57 = vpop.f32.mrb[21].mxu1  ;;  %v521_v58 = vpop.f32.mrb[23].mxu0 }
 0x305   :  { %826 = vtanh.f32 %v519_v53  ;;  %v570_v59 = vadd.f32 %v569_v57, %v445_v52  ;;  %v571_v60 = vpop.f32.mrb[22].mxu1 }
 0x306   :  { %v809_v61 = vpop.eup %808  ;;  %828 = vtanh.f32 %v568_v56  ;;  %v572_v62 = vpop.f32.mrb[23].mxu1 }
 0x307   :  { %v811_v63 = vpop.eup %810  ;;  %830 = vtanh.f32 %v570_v59 }
 0x308   :  { %v813_v0 = vpop.eup %812 }
 0x309   :  { %v815_v1 = vpop.eup %814  ;;  %v586_v2 = vpack.c.bf16 %v813_v0, %v809_v61 }
 0x30a   :  { %v817_v4 = vpop.eup %816 }
 0x30b   :  { %v819_v5 = vpop.eup %818  ;;  %v587_v6 = vpack.c.bf16 %v817_v4, %v811_v63 }
 0x30c   :  { %v821_v7 = vpop.eup %820 }
 0x30d   :  { %v823_v8 = vpop.eup %822  ;;  %618 = vmatprep.subr.bf16.mxu0 %v587_v6  ;;  %v588_v9 = vpack.c.bf16 %v821_v7, %v815_v1 }
 0x30e   :  { %v825_v10 = vpop.eup %824  ;;  %619 = vmatpush1.bf16.msra.mxu0 %v586_v2  ;;  %v589_v11 = vpack.c.bf16 %v823_v8, %v819_v5 }
 0x30f   :  { %v827_v12 = vpop.eup %826  ;;  %v590_v13 = vpack.c.bf16 %v825_v10, %v825_v10 }
 0x310   :  { %v829_v14 = vpop.eup %828  ;;  %v591_v15 = vpack.c.bf16 %v827_v12, %v827_v12  ;;  %659 = vmatprep.subr.bf16.mxu1 %v589_v11 }
 0x311   :  { %v831_v16 = vpop.eup %830  ;;  %v592_v17 = vpack.c.bf16 %v829_v14, %v829_v14  ;;  %660 = vmatpush1.bf16.msra.mxu1 %v588_v9  ;;  %v607_v18 = vsel %vm296_vm2, %v590_v13, 0 }
 0x312   :  { %v593_v19 = vpack.c.bf16 %v831_v16, %v831_v16  ;;  %740 = vmatprep.subr.msk.bf16.mxu0 %vm296_vm2, %v591_v15 }
 0x313   :  { %621 = vmatpush1.bf16.msra.mxu0 %v607_v18  ;;  %v613_v20 = vsel %vm296_vm2, %v592_v17, 0 }
 0x314   :  { %742 = vmatprep.subr.msk.bf16.mxu1 %vm296_vm2, %v593_v19 }
 0x315   :  { %662 = vmatpush1.bf16.msra.mxu1 %v613_v20 }
 0x316   :  { %741 = vmatmul.mubr.msk.bf16.vlgmr.msra.gmra.mrb[24].mxu0 %vm289_vm3, %v594_v21 }
 0x318   :  { %743 = vmatmul.mubr.msk.bf16.vlgmr.msra.gmra.mrb[24].mxu1 %vm289_vm3, %v594_v21 }
 0x3e9   :  { %v652_v25 = vpop.f32.mrb[24].mxu0 }
 0x3ea   :  { %v653_v27 = vadd.f32 %v652_v25, %v595_v22  ;;  %v654_v28 = vpop.f32.mrb[25].mxu0 }
 0x3eb   :  { %v693_v29 = vpop.f32.mrb[24].mxu1  ;;  %v655_v30 = vadd.f32 %v654_v28, %v599_v24  ;;  %v656_v31 = vpop.f32.mrb[26].mxu0 }
 0x3ec   :  { %v694_v32 = vadd.f32 %v693_v29, %v596_v23  ;;  %v695_v33 = vpop.f32.mrb[25].mxu1  ;;  %v657_v34 = vpop.f32.mrb[27].mxu0 }
 0x3ed   :  { %v704_v35 = vcombine.low %v653_v27, %v655_v30  ;;  %v696_v36 = vadd.f32 %v695_v33, %v600_v26  ;;  %v697_v37 = vpop.f32.mrb[26].mxu1 }
 0x3ee   :  { %v698_v38 = vpop.f32.mrb[27].mxu1 }
 0x3ef   :  { %708 = vst [vmem:[%s1092_s9] sm:$0x77] %v704_v35  ;;  %v705_v39 = vcombine.low %v694_v32, %v696_v36 }
 0x3f1   :  { %709 = vst [vmem:[%s1092_s9 + $0x8] sm:$0x77] %v705_v39 }
 0x3f2   :  { %714 = vsyncpa [#allocation3], 1 }
 0x3f3   :  { %715 = vsyncpa [#allocation5], 1 }

</bundles_post_ra>
